<compile_context>
chip_gen: v7x
topology: tpu7x:2x2x1
jax: 0.10.0
libtpu: 0.0.40
codegen_flags: <defaults>
</compile_context>

<pallas_src>
import jax
import jax.numpy as jnp
from jax.experimental import pallas as pl
from jax.experimental.pallas import tpu as pltpu


def _round_up(x, m):
    return ((x + m - 1) // m) * m


def _mlp_kernel(x_ref, w1_ref, b1_ref, w2_ref, b2_ref, w3_ref, b3_ref, out_ref):
    # x_ref: [TB, in_dim] f32 (both tuple halves already folded into rows).
    # w*_ref / b*_ref: f32, hidden dims zero-padded to 128 (lane dense).
    x = x_ref[...]
    h1 = jnp.dot(x, w1_ref[...], preferred_element_type=jnp.float32) + b1_ref[...]
    h1 = jnp.maximum(h1, 0.0)
    h2 = jnp.dot(h1, w2_ref[...], preferred_element_type=jnp.float32) + b2_ref[...]
    h2 = jnp.maximum(h2, 0.0)
    y = jnp.dot(h2, w3_ref[...], preferred_element_type=jnp.float32) + b3_ref[...]
    out_ref[...] = y.astype(out_ref.dtype)


def prepare_params(params):
    """One-time weight prep (hoisted off the per-call path):
    zero-pad the hidden dims (32 -> 128, 64 -> 128) so intermediate activations
    are lane-dense. Padding is exact zeros -> numerics unchanged. Stays f32."""
    w1, b1, w2, b2, w3, b3 = params
    hid1, hid2 = w1.shape[1], w2.shape[1]
    H1 = _round_up(hid1, 128)
    H2 = _round_up(hid2, 128)
    w1p = jnp.pad(w1, ((0, 0), (0, H1 - hid1)))
    b1p = jnp.pad(b1.reshape(1, -1), ((0, 0), (0, H1 - hid1)))
    w2p = jnp.pad(w2, ((0, H1 - hid1), (0, H2 - hid2)))
    b2p = jnp.pad(b2.reshape(1, -1), ((0, 0), (0, H2 - hid2)))
    w3p = jnp.pad(w3, ((0, H2 - hid2), (0, 0)))
    b3p = b3.reshape(1, -1)
    return (w1p, b1p, w2p, b2p, w3p, b3p)


def decoder_simple_forward(inp, prepared_params, hidden_in=None, tile_b=1024):
    """inp: [2, B, input_size] f32. Returns (output, hidden) = (y[0], y[1]).

    `hidden_in` is accepted for API parity with the PyTorch forward but ignored
    (the PyTorch module ignores it as well)."""
    del hidden_in
    w1p, b1p, w2p, b2p, w3p, b3p = prepared_params
    two, B, in_dim = inp.shape
    assert two == 2, "tuple-unpack in the PyTorch forward requires leading dim == 2"
    out_dim = w3p.shape[1]
    H1, H2 = w1p.shape[1], w2p.shape[1]

    # Fold the size-2 tuple axis into the row (M) dimension: free bitcast reshape.
    M = 2 * B
    x2d = inp.reshape(M, in_dim)

    # Row tiling: multiple of 8 (f32 sublane), capped at tile_b rows/step.
    # Force >= 2 grid steps when there is enough work (v7x dual-TC) while keeping
    # padding waste small.
    nb = -(-M // tile_b)
    if nb < 2 and M > 8:
        nb = 2
    TB = _round_up(-(-M // nb), 8)
    M_pad = nb * TB
    if M_pad != M:
        x2d = jnp.pad(x2d, ((0, M_pad - M), (0, 0)))

    def const_spec(shape):
        # Same block every grid step -> stays VMEM-resident, no re-DMA.
        return pl.BlockSpec(shape, lambda i: (0, 0))

    flops = 2 * M_pad * (in_dim * H1 + H1 * H2 + H2 * out_dim)
    bytes_accessed = 4 * (M_pad * in_dim + M_pad * out_dim
                          + w1p.size + b1p.size + w2p.size + b2p.size
                          + w3p.size + b3p.size)

    out2d = pl.pallas_call(
        _mlp_kernel,
        out_shape=jax.ShapeDtypeStruct((M_pad, out_dim), jnp.float32),
        grid=(nb,),
        in_specs=[
            pl.BlockSpec((TB, in_dim), lambda i: (i, 0)),   # activation stream
            const_spec(w1p.shape), const_spec(b1p.shape),
            const_spec(w2p.shape), const_spec(b2p.shape),
            const_spec(w3p.shape), const_spec(b3p.shape),
        ],
        out_specs=pl.BlockSpec((TB, out_dim), lambda i: (i, 0)),
        compiler_params=pltpu.CompilerParams(
            dimension_semantics=("parallel",)),
        cost_estimate=pl.CostEstimate(flops=flops, transcendentals=0,
                                      bytes_accessed=bytes_accessed),
    )(x2d, w1p, b1p, w2p, b2p, w3p, b3p)

    # Split the merged output back into (output, hidden) = (y[0], y[1]).
    return out2d[:B], out2d[B:2 * B]


def init_params(key, input_size, hidden_size, output_size):
    # nn.Linear(in, out) has weight [out, in]; we store the transpose [in, out].
    k1, k2, k3, k4, k5, k6 = jax.random.split(key, 6)
    s1 = 1.0 / jnp.sqrt(input_size)
    s2 = 1.0 / jnp.sqrt(hidden_size)
    s3 = 1.0 / jnp.sqrt(64.0)
    w1 = jax.random.uniform(k1, (input_size, hidden_size), jnp.float32, -s1, s1)
    b1 = jax.random.uniform(k2, (1, hidden_size), jnp.float32, -s1, s1)
    w2 = jax.random.uniform(k3, (hidden_size, 64), jnp.float32, -s2, s2)
    b2 = jax.random.uniform(k4, (1, 64), jnp.float32, -s2, s2)
    w3 = jax.random.uniform(k5, (64, output_size), jnp.float32, -s3, s3)
    b3 = jax.random.uniform(k6, (1, output_size), jnp.float32, -s3, s3)
    return (w1, b1, w2, b2, w3, b3)


if __name__ == "__main__":
    key = jax.random.PRNGKey(0)
    input_size, hidden_size, output_size = 32, 32, 16
    # fc_units / num_grulstm_layers are unused by the PyTorch module's forward.

    kx, kp = jax.random.split(key)
    params = init_params(kp, input_size, hidden_size, output_size)
    prepped = prepare_params(params)        # hoisted: done once, not per call

    fwd = jax.jit(decoder_simple_forward)

    w1, b1, w2, b2, w3, b3 = params
    for B in (8, 13):                       # 13 exercises the row-padding path
        inp = jax.random.normal(jax.random.fold_in(kx, B),
                                (2, B, input_size), jnp.float32)
        output, hidden = fwd(inp, prepped)
        jax.block_until_ready((output, hidden))

        # Full-f32 reference (module semantics).
        x2d = inp.reshape(2 * B, input_size)
        r = jnp.maximum(x2d @ w1 + b1, 0.0)
        r = jnp.maximum(r @ w2 + b2, 0.0)
        ref = (r @ w3 + b3).reshape(2, B, output_size)

        assert output.shape == (B, output_size), output.shape
        assert hidden.shape == (B, output_size), hidden.shape
        assert jnp.allclose(output, ref[0], atol=2e-2, rtol=2e-2)
        assert jnp.allclose(hidden, ref[1], atol=2e-2, rtol=2e-2)

    print("KERNEL_OK")
</pallas_src>

<mosaic_0001>
module attributes {stable_mosaic.version = 11 : i64} {
  func.func @_mlp_kernel(%arg0: i32, %arg1: memref<8x32xf32, #tpu.memory_space<vmem>>, %arg2: memref<32x128xf32, #tpu.memory_space<vmem>>, %arg3: memref<1x128xf32, #tpu.memory_space<vmem>>, %arg4: memref<128x128xf32, #tpu.memory_space<vmem>>, %arg5: memref<1x128xf32, #tpu.memory_space<vmem>>, %arg6: memref<128x16xf32, #tpu.memory_space<vmem>>, %arg7: memref<1x16xf32, #tpu.memory_space<vmem>>, %arg8: memref<8x16xf32, #tpu.memory_space<vmem>>) attributes {dimension_semantics = [#tpu.dimension_semantics<parallel>], iteration_bounds = array<i64: 2>, scalar_prefetch = 0 : i64, scratch_operands = 0 : i64, tpu.core_type = #tpu.core_type<tc>, window_params = [{transform_indices = @transform_0, window_bounds = array<i64: 8, 32>}, {pipeline_mode = #tpu.pipeline_mode<synchronous>, transform_indices = @transform_1, window_bounds = array<i64: 32, 128>}, {pipeline_mode = #tpu.pipeline_mode<synchronous>, transform_indices = @transform_2, window_bounds = array<i64: 1, 128>}, {pipeline_mode = #tpu.pipeline_mode<synchronous>, transform_indices = @transform_3, window_bounds = array<i64: 128, 128>}, {pipeline_mode = #tpu.pipeline_mode<synchronous>, transform_indices = @transform_4, window_bounds = array<i64: 1, 128>}, {pipeline_mode = #tpu.pipeline_mode<synchronous>, transform_indices = @transform_5, window_bounds = array<i64: 128, 16>}, {pipeline_mode = #tpu.pipeline_mode<synchronous>, transform_indices = @transform_6, window_bounds = array<i64: 1, 16>}, {transform_indices = @transform_7, window_bounds = array<i64: 8, 16>}]} {
    %c0 = arith.constant 0 : index
    %c0_0 = arith.constant 0 : index
    %0 = vector.load %arg1[%c0, %c0_0] : memref<8x32xf32, #tpu.memory_space<vmem>>, vector<8x32xf32>
    %c0_1 = arith.constant 0 : index
    %c0_2 = arith.constant 0 : index
    %1 = vector.load %arg2[%c0_1, %c0_2] : memref<32x128xf32, #tpu.memory_space<vmem>>, vector<32x128xf32>
    %cst = arith.constant dense<0.000000e+00> : vector<8x128xf32>
    %2 = tpu.matmul %0, %1, %cst {dimension_numbers = #tpu.dot_dimension_numbers<[1], [0], [0], [1], [0, 0, 1, 1], [], []>} : vector<8x32xf32>, vector<32x128xf32>, vector<8x128xf32> -> vector<8x128xf32>
    %c0_3 = arith.constant 0 : index
    %c0_4 = arith.constant 0 : index
    %3 = vector.load %arg3[%c0_3, %c0_4] : memref<1x128xf32, #tpu.memory_space<vmem>>, vector<1x128xf32>
    %4 = vector.broadcast %3 : vector<1x128xf32> to vector<8x128xf32>
    %5 = arith.addf %2, %4 : vector<8x128xf32>
    %cst_5 = arith.constant 0.000000e+00 : f32
    %6 = vector.broadcast %cst_5 : f32 to vector<8x128xf32>
    %7 = arith.maximumf %5, %6 : vector<8x128xf32>
    %c0_6 = arith.constant 0 : index
    %c0_7 = arith.constant 0 : index
    %8 = vector.load %arg4[%c0_6, %c0_7] : memref<128x128xf32, #tpu.memory_space<vmem>>, vector<128x128xf32>
    %cst_8 = arith.constant dense<0.000000e+00> : vector<8x128xf32>
    %9 = tpu.matmul %7, %8, %cst_8 {dimension_numbers = #tpu.dot_dimension_numbers<[1], [0], [0], [1], [0, 0, 1, 1], [], []>} : vector<8x128xf32>, vector<128x128xf32>, vector<8x128xf32> -> vector<8x128xf32>
    %c0_9 = arith.constant 0 : index
    %c0_10 = arith.constant 0 : index
    %10 = vector.load %arg5[%c0_9, %c0_10] : memref<1x128xf32, #tpu.memory_space<vmem>>, vector<1x128xf32>
    %11 = vector.broadcast %10 : vector<1x128xf32> to vector<8x128xf32>
    %12 = arith.addf %9, %11 : vector<8x128xf32>
    %cst_11 = arith.constant 0.000000e+00 : f32
    %13 = vector.broadcast %cst_11 : f32 to vector<8x128xf32>
    %14 = arith.maximumf %12, %13 : vector<8x128xf32>
    %c0_12 = arith.constant 0 : index
    %c0_13 = arith.constant 0 : index
    %15 = vector.load %arg6[%c0_12, %c0_13] : memref<128x16xf32, #tpu.memory_space<vmem>>, vector<128x16xf32>
    %cst_14 = arith.constant dense<0.000000e+00> : vector<8x16xf32>
    %16 = tpu.matmul %14, %15, %cst_14 {dimension_numbers = #tpu.dot_dimension_numbers<[1], [0], [0], [1], [0, 0, 1, 1], [], []>} : vector<8x128xf32>, vector<128x16xf32>, vector<8x16xf32> -> vector<8x16xf32>
    %c0_15 = arith.constant 0 : index
    %c0_16 = arith.constant 0 : index
    %17 = vector.load %arg7[%c0_15, %c0_16] : memref<1x16xf32, #tpu.memory_space<vmem>>, vector<1x16xf32>
    %18 = vector.broadcast %17 : vector<1x16xf32> to vector<8x16xf32>
    %19 = arith.addf %16, %18 : vector<8x16xf32>
    %c0_17 = arith.constant 0 : index
    %c0_18 = arith.constant 0 : index
    %20 = vector.load %arg8[%c0_17, %c0_18] : memref<8x16xf32, #tpu.memory_space<vmem>>, vector<8x16xf32>
    tpu.vector_store %arg8[%c0_17, %c0_18], %19 {strides = array<i32>} : memref<8x16xf32, #tpu.memory_space<vmem>>, vector<8x16xf32>,
    return
  }
  func.func @transform_0(%arg0: i32) -> (i32, i32) {
    %c0_i32 = arith.constant 0 : i32
    %c0_i32_0 = arith.constant 0 : i32
    return %arg0, %c0_i32 : i32, i32
  }
  func.func @transform_1(%arg0: i32) -> (i32, i32) {
    %c0_i32 = arith.constant 0 : i32
    %c0_i32_0 = arith.constant 0 : i32
    %c0_i32_1 = arith.constant 0 : i32
    return %c0_i32, %c0_i32_0 : i32, i32
  }
  func.func @transform_2(%arg0: i32) -> (i32, i32) {
    %c0_i32 = arith.constant 0 : i32
    %c0_i32_0 = arith.constant 0 : i32
    %c0_i32_1 = arith.constant 0 : i32
    return %c0_i32, %c0_i32_0 : i32, i32
  }
  func.func @transform_3(%arg0: i32) -> (i32, i32) {
    %c0_i32 = arith.constant 0 : i32
    %c0_i32_0 = arith.constant 0 : i32
    %c0_i32_1 = arith.constant 0 : i32
    return %c0_i32, %c0_i32_0 : i32, i32
  }
  func.func @transform_4(%arg0: i32) -> (i32, i32) {
    %c0_i32 = arith.constant 0 : i32
    %c0_i32_0 = arith.constant 0 : i32
    %c0_i32_1 = arith.constant 0 : i32
    return %c0_i32, %c0_i32_0 : i32, i32
  }
  func.func @transform_5(%arg0: i32) -> (i32, i32) {
    %c0_i32 = arith.constant 0 : i32
    %c0_i32_0 = arith.constant 0 : i32
    %c0_i32_1 = arith.constant 0 : i32
    return %c0_i32, %c0_i32_0 : i32, i32
  }
  func.func @transform_6(%arg0: i32) -> (i32, i32) {
    %c0_i32 = arith.constant 0 : i32
    %c0_i32_0 = arith.constant 0 : i32
    %c0_i32_1 = arith.constant 0 : i32
    return %c0_i32, %c0_i32_0 : i32, i32
  }
  func.func @transform_7(%arg0: i32) -> (i32, i32) {
    %c0_i32 = arith.constant 0 : i32
    %c0_i32_0 = arith.constant 0 : i32
    return %arg0, %c0_i32 : i32, i32
  }
}

</mosaic_0001>

<bundles_post_ra>
// kernel: decoder_simple_forward.1
= control target key start
LH: loop header
LB: loop body
LE: loop exit
PB: predicated region body
PF: predicated region fallthrough
CT: control target
= control target key end

     0   :  { %12 = vsyncpa [#allocation3], 0  ;;  %s929_s24 = smov 0   ;;  %s1118_s0 = inlined_call_operand.vmem [shape: f32[16,32], index: 0, kind: input, shape index: {}]   ;;  %s1119_s1 = inlined_call_operand.hbm [shape: f32[32,128], index: 1, kind: input, shape index: {}]   ;;  %s1120_s2 = inlined_call_operand.vmem [shape: f32[1,128], index: 2, kind: input, shape index: {}]   ;;  %s1121_s3 = inlined_call_operand.vmem [shape: f32[128,128], index: 3, kind: input, shape index: {}]   ;;  %s1122_s4 = inlined_call_operand.vmem [shape: f32[1,128], index: 4, kind: input, shape index: {}]   ;;  %s1123_s5 = inlined_call_operand.vmem [shape: f32[128,16], index: 5, kind: input, shape index: {}]   ;;  %s1124_s6 = inlined_call_operand.vmem [shape: f32[1,16], index: 6, kind: input, shape index: {}]   ;;  %s1125_s7 = inlined_call_operand.vmem [shape: f32[16,16], index: 7, kind: output, shape index: {}]  }
   0x1 LB: > { %s935_s25 = sadd.s32 4294967295, %s881_s24   ;;  %p632_p0 = scmp.ge.s32.totalorder %s881_s24, 1  ;;  %s881_s24 = sphi %s929_s24, %s18_s24  }
   0x2   : > { %p201_p1 = scmp.lt.s32.totalorder %s881_s24, 3  ;;  %s883_s26 = smov [#allocation2]  }
   0x3   : > { %s213_s27 = sshll.u32 %s883_s26, 4  ;;  %p1126_p3 = scmp.eq.s32.totalorder %s935_s25, 0  ;;  %s214_s27 = int_to_ptr.vmem [resolvable:$true] %s213_s27 }
   0x4   : > { %p939_p2 = pnand %p632_p0, %p201_p1  ;;  %s843_s9 = scalar_lea.hbm %s1119_s1, 512 }
   0x5   : > { %p844_p6 = scmp.ne.s32.totalorder %s1119_s1, %s843_s9  ;;  %p850_p10 = scmp.lt.u32.totalorder %s843_s9, %s1119_s1 }
   0x6   : > { %s1128_s28 = scalar_select %p939_p2, 1, 0 }
   0x7   : > { %p823_p4 = pneg %p939_p2 }
   0x9   : > { %p948_p5 = pnand %p1126_p3, %p823_p4 }
   0xb   : > { %p845_p7 = pneg %p948_p5 }
   0xd   : > { %p846_p8 = pnand %p845_p7, %p844_p6 }
   0xf   : > { %p847_p9 = pneg %p846_p8 }
  0x11   : > { %p852_p11 = pnand %p850_p10, %p847_p9 }
  0x13   : > { %855 = shalt.err (!%p852_p11)
}
  0x14   : > { %s856_s14 = scalar_lea.vmem %s214_s27, 512  ;;  %p864_p1 = scmp.lt.s32.totalorder %s214_s27, %s214_s27 }
  0x15   : > { %p857_p12 = scmp.ne.s32.totalorder %s214_s27, %s856_s14  ;;  %p865_p4 = scmp.lt.s32.totalorder %s856_s14, %s856_s14 }
  0x17   : > { %p859_p13 = pnand %p857_p12, %p845_p7  ;;  %p866_p3 = por %p865_p4, %p864_p1 }
  0x19   : > { %p860_p0 = pneg %p859_p13 }
  0x1b   : > { %p867_p2 = pnand %p866_p3, %p860_p0 }
  0x1d   : > { %870 = shalt.err (!%p867_p2)
}
  0x1e   : > { %s884_s15 = smov 128   ;;  %s885_s16 = smov 8  }
  0x1f   : > { %826 = dma.hbm_to_vmem [thread:$0]  (!%p948_p5), %s1119_s1, 512, %s214_s27, [#allocation3], %s884_s15, %s884_s15, %s885_s16  }
  0x20   : > { %p1130_p6 = scmp.ne.s32.totalorder %s1128_s28, 0 }
  0x21   : > { %p1131_p8 = scmp.eq.s32.totalorder (!%p1130_p6), %s935_s25, 0 }
  0x22   : > { %251 = sbr.rel (%p1130_p6) target bundleno = 699 (0x2bb), region = 48 }
  0x29   : > { %876 = dma.done.wait (%p1131_p8), [#allocation3], 512   ;;  %p1132_p7 = pmov %p1131_p8 }
  0x2a   : > { %p281_p2 = scmp.lt.s32.totalorder %s935_s25, 1  ;;  %v886_v0 = vmov 0.0|0.0   ;;  %vm887_vm0 = vmmov 0   ;;  %v888_v1 = vmov 0.0   ;;  %v290_v2 = vld [vmem:[#allocation2] sm:$0xff]  ;;  %v291_v3 = vld [vmem:[#allocation2 + $0x8] sm:$0xff] }
  0x2b   : > { %878 = vsyncadd (%p1132_p7), [#allocation3], 4294966784  ;;  %765 = vmatprep.subr.bf16.mxu0 %v886_v0  ;;  %692 = vmatprep.mubr.msk.f32.mxu0 %vm887_vm0, %v888_v1  ;;  %v292_v4 = vld [vmem:[#allocation2 + $0x10] sm:$0xff]  ;;  %v766_v5 = vpack.c.bf16 %v291_v3, %v290_v2  ;;  %v293_v6 = vld [vmem:[#allocation2 + $0x18] sm:$0xff]  ;;  %vm301_vm1 = vcmask 261120   ;;  %vm563_vm2 = vcmask 130048  }
  0x2c   : > { %771 = vmatprep.subr.bf16.mxu1 %v886_v0  ;;  %727 = vmatprep.mubr.msk.f32.mxu1 %vm887_vm0, %v888_v1  ;;  %s1134_s25 = smov (!%p281_p2, %s935_s25), 1  ;;  %v376_v7 = vld [vmem:[%s1121_s3] sm:$0xff]  ;;  %v377_v8 = vld [vmem:[%s1121_s3 + $0x8] sm:$0xff]  ;;  %v378_v9 = vld [vmem:[%s1121_s3 + $0x10] sm:$0xff]  ;;  %v769_v11 = vpack.c.bf16 %v293_v6, %v292_v4 }
  0x2d   : > { %s637_s19 = sshll.u32 %s1134_s25, 3  ;;  %v379_v10 = vld [vmem:[%s1121_s3 + $0x18] sm:$0xff]  ;;  %767 = vmatpush3.bf16.msra.mxu0 %v766_v5  ;;  %v772_v12 = vpack.c.bf16 %v377_v8, %v376_v7  ;;  %v380_v14 = vld [vmem:[%s1121_s3 + $0x20] sm:$0xff]  ;;  %v381_v15 = vld [vmem:[%s1121_s3 + $0x28] sm:$0xff] }
  0x2e   : > { %768 = vmatprep.subr.bf16.mxu0 %v886_v0  ;;  %s284_s9 = scalar_lea.vmem %s1118_s0, %s637_s19  ;;  %v775_v13 = vpack.c.bf16 %v379_v10, %v378_v9  ;;  %v778_v17 = vpack.c.bf16 %v381_v15, %v380_v14  ;;  %v382_v18 = vld [vmem:[%s1121_s3 + $0x30] sm:$0xff]  ;;  %v383_v19 = vld [vmem:[%s1121_s3 + $0x38] sm:$0xff]  ;;  %v384_v21 = vld [vmem:[%s1121_s3 + $0x40] sm:$0xff]  ;;  %s288_s14 = scalar_lea.vmem %s1125_s7, %s637_s19 }
  0x2f   : > { %773 = vmatpush3.bf16.msra.mxu1 %v772_v12  ;;  %v289_v16 = vld [vmem:[%s284_s9] sm:$0xff]  ;;  %v781_v20 = vpack.c.bf16 %v383_v19, %v382_v18  ;;  %v385_v22 = vld [vmem:[%s1121_s3 + $0x48] sm:$0xff]  ;;  %v386_v24 = vld [vmem:[%s1121_s3 + $0x50] sm:$0xff] }
  0x30   : > { %774 = vmatprep.subr.bf16.mxu1 %v886_v0  ;;  %v784_v23 = vpack.c.bf16 %v385_v22, %v384_v21  ;;  %v387_v25 = vld [vmem:[%s1121_s3 + $0x58] sm:$0xff]  ;;  %v388_v27 = vld [vmem:[%s1121_s3 + $0x60] sm:$0xff]  ;;  %v389_v28 = vld [vmem:[%s1121_s3 + $0x68] sm:$0xff] }
  0x31   : > { %770 = vmatpush3.bf16.msra.mxu0 %v769_v11  ;;  %v787_v26 = vpack.c.bf16 %v387_v25, %v386_v24  ;;  %v790_v29 = vpack.c.bf16 %v389_v28, %v388_v27  ;;  %v390_v30 = vld [vmem:[%s1121_s3 + $0x70] sm:$0xff]  ;;  %v391_v31 = vld [vmem:[%s1121_s3 + $0x78] sm:$0xff]  ;;  %v470_v33 = vld [vmem:[%s1123_s5] sm:$0xff] }
  0x32   : > { %795 = vmatprep.subr.bf16.mxu0 %v886_v0  ;;  %v793_v32 = vpack.c.bf16 %v391_v31, %v390_v30  ;;  %v471_v34 = vld [vmem:[%s1123_s5 + $0x8] sm:$0xff]  ;;  %v472_v35 = vld [vmem:[%s1123_s5 + $0x10] sm:$0xff]  ;;  %v473_v37 = vld [vmem:[%s1123_s5 + $0x18] sm:$0xff] }
  0x33   : > { %776 = vmatpush3.bf16.msra.mxu1 %v775_v13  ;;  %v796_v36 = vpack.c.bf16 %v471_v34, %v470_v33  ;;  %v799_v38 = vpack.c.bf16 %v473_v37, %v472_v35  ;;  %v474_v39 = vld [vmem:[%s1123_s5 + $0x20] sm:$0xff]  ;;  %v475_v40 = vld [vmem:[%s1123_s5 + $0x28] sm:$0xff]  ;;  %v476_v42 = vld [vmem:[%s1123_s5 + $0x30] sm:$0xff] }
  0x34   : > { %693 = vmatmul.mubr.msk.f32.vlgmr.msra.gmra.mrb[0].mxu0 %vm301_vm1, %v289_v16  ;;  %777 = vmatprep.subr.bf16.mxu1 %v886_v0  ;;  %v802_v41 = vpack.c.bf16 %v475_v40, %v474_v39  ;;  %v477_v43 = vld [vmem:[%s1123_s5 + $0x38] sm:$0xff]  ;;  %v478_v45 = vld [vmem:[%s1123_s5 + $0x40] sm:$0xff]  ;;  %v479_v46 = vld [vmem:[%s1123_s5 + $0x48] sm:$0xff] }
  0x35   : > { %762 = vmatprep.mubr.msk.f32.mxu0 %vm887_vm0, %v888_v1  ;;  %797 = vmatpush3.bf16.msra.mxu0 %v796_v36  ;;  %v805_v44 = vpack.c.bf16 %v477_v43, %v476_v42  ;;  %v808_v47 = vpack.c.bf16 %v479_v46, %v478_v45  ;;  %v480_v48 = vld [vmem:[%s1123_s5 + $0x50] sm:$0xff]  ;;  %v481_v49 = vld [vmem:[%s1123_s5 + $0x58] sm:$0xff]  ;;  %v482_v51 = vld [vmem:[%s1123_s5 + $0x60] sm:$0xff] }
  0x36   : > { %798 = vmatprep.subr.bf16.mxu0 %v886_v0  ;;  %v811_v50 = vpack.c.bf16 %v481_v49, %v480_v48  ;;  %v483_v52 = vld [vmem:[%s1123_s5 + $0x68] sm:$0xff]  ;;  %v639_v54 = vld [vmem:[%s1120_s2] ss:$0 sm:$0xff]  ;;  %v484_v59 = vld [vmem:[%s1123_s5 + $0x70] sm:$0xff] }
  0x37   : > { %779 = vmatpush3.bf16.msra.mxu1 %v778_v17  ;;  %v814_v53 = vpack.c.bf16 %v483_v52, %v482_v51  ;;  %v485_v60 = vld [vmem:[%s1123_s5 + $0x78] sm:$0xff]  ;;  %v641_v62 = vld [vmem:[%s1122_s4] ss:$0 sm:$0xff] }
  0x38   : > { %780 = vmatprep.subr.bf16.mxu1 %v886_v0  ;;  %v817_v61 = vpack.c.bf16 %v485_v60, %v484_v59  ;;  %v642_v3 = vld [vmem:[%s1124_s6] ss:$0 sm:$0xff] }
  0x39   : > { %800 = vmatpush3.bf16.msra.mxu0 %v799_v38 }
  0x3a   : > { %801 = vmatprep.subr.bf16.mxu0 %v886_v0 }
  0x3b   : > { %782 = vmatpush3.bf16.msra.mxu1 %v781_v20 }
  0x3c   : > { %783 = vmatprep.subr.bf16.mxu1 %v886_v0 }
  0x3d   : > { %803 = vmatpush3.bf16.msra.mxu0 %v802_v41 }
  0x3e   : > { %804 = vmatprep.subr.bf16.mxu0 %v886_v0 }
  0x3f   : > { %785 = vmatpush3.bf16.msra.mxu1 %v784_v23 }
  0x40   : > { %786 = vmatprep.subr.bf16.mxu1 %v886_v0 }
  0x41   : > { %806 = vmatpush3.bf16.msra.mxu0 %v805_v44 }
  0x42   : > { %807 = vmatprep.subr.bf16.mxu0 %v886_v0 }
  0x43   : > { %788 = vmatpush3.bf16.msra.mxu1 %v787_v26 }
  0x44   : > { %789 = vmatprep.subr.bf16.mxu1 %v886_v0 }
  0x45   : > { %809 = vmatpush3.bf16.msra.mxu0 %v808_v47 }
  0x46   : > { %810 = vmatprep.subr.bf16.mxu0 %v886_v0 }
  0x47   : > { %791 = vmatpush3.bf16.msra.mxu1 %v790_v29 }
  0x48   : > { %792 = vmatprep.subr.bf16.mxu1 %v886_v0 }
  0x49   : > { %812 = vmatpush3.bf16.msra.mxu0 %v811_v50 }
  0x4a   : > { %813 = vmatprep.subr.bf16.mxu0 %v886_v0 }
  0x4b   : > { %794 = vmatpush3.bf16.msra.mxu1 %v793_v32 }
  0x4d   : > { %815 = vmatpush3.bf16.msra.mxu0 %v814_v53 }
  0x4e   : > { %816 = vmatprep.subr.bf16.mxu0 %v886_v0 }
  0x51   : > { %818 = vmatpush3.bf16.msra.mxu0 %v817_v61 }
 0x107   : > { %v371_v55 = vpop.f32.mrb[0].mxu0 }
 0x108   : > { %v372_v56 = vadd.f32 %v639_v54, %v371_v55  ;;  %v694_v57 = vpop.f32.mrb[1].mxu0 }
 0x10a   : > { %v375_v58 = vmax.f32 %v372_v56, 0.0 }
 0x10c   : > { %728 = vmatmul.mubr.f32.vlgmr.msra.gmra.mrb[0].mxu1 %v375_v58 }
 0x1df   : > { %v465_v63 = vpop.f32.mrb[0].mxu1 }
 0x1e0   : > { %v466_v0 = vadd.f32 %v641_v62, %v465_v63  ;;  %v729_v1 = vpop.f32.mrb[1].mxu1 }
 0x1e2   : > { %v469_v2 = vmax.f32 %v466_v0, 0.0 }
 0x1e4   : > { %763 = vmatmul.mubr.f32.vlgmr.msra.gmra.mrb[2].mxu0 %v469_v2 }
 0x2b7   : > { %v559_v4 = vpop.f32.mrb[2].mxu0 }
 0x2b8   : > { %v560_v5 = vadd.f32 %v642_v3, %v559_v4  ;;  %v764_v6 = vpop.f32.mrb[3].mxu0 }
 0x2ba   : > { %564 = vst.msk [vmem:[%s288_s14] sm:$0xff] %vm563_vm2, %v560_v5 }
 0x2bb PF: > { %s18_s24 = sadd.s32 1, %s881_s24  }
 0x2bc   : > { %p15_p3 = scmp.ge.s32.totalorder %s18_s24, 4  }
 0x2be   :  { %17 = sbr.rel (!%p15_p3) target bundleno = 1 (0x1), region = 83 }
 0x2c5   :  { %584 = vsyncpa [#allocation3], 1 }
 0x2c6   :  { %586 = vsyncpa [#allocation3 + $0x1], 1 }

</bundles_post_ra>
